<compile_context>
chip_gen: v6e
topology: v6e:2x2x1
jax: 0.10.0
libtpu: 0.0.40
codegen_flags: <defaults>
</compile_context>

<pallas_src>
import jax
import jax.numpy as jnp
from jax.experimental import pallas as pl
from jax.experimental.pallas import tpu as pltpu


def _round_up(n, m):
    return -(-n // m) * m


def pack_opnet_params(w1, b1, w2, b2):
    """Pack (and pre-transpose) all OpNet parameters into one f32 buffer.

    Done once at parameter-creation time so every forward call issues a single
    parameter DMA and zero wrapper-side transposes.

    Row layout (each section starts on a sublane multiple of 8):
      [off_w1 : off_w1+S)  w1.T  (S, H)  in cols [0:H)
      [off_b1]             b1    (1, H)  in cols [0:H)
      [off_w2 : off_w2+H)  w2.T  (H, A)  in cols [0:A)
      [off_b2]             b2    (1, A)  in cols [0:A)
    Width W = max(H, A); all padding is zeros, so the padded lanes stay zero
    through the matmuls and are sliced off before the output store.
    """
    H, S = w1.shape
    A, H2 = w2.shape
    assert H2 == H
    W = max(H, A)

    off_w1 = 0
    off_b1 = _round_up(S, 8)
    off_w2 = off_b1 + 8
    off_b2 = off_w2 + _round_up(H, 8)
    total_rows = off_b2 + 8

    P = jnp.zeros((total_rows, W), jnp.float32)
    P = P.at[off_w1:off_w1 + S, :H].set(jnp.asarray(w1, jnp.float32).T)
    P = P.at[off_b1, :H].set(jnp.asarray(b1, jnp.float32))
    P = P.at[off_w2:off_w2 + H, :A].set(jnp.asarray(w2, jnp.float32).T)
    P = P.at[off_b2, :A].set(jnp.asarray(b2, jnp.float32))

    meta = dict(S=S, H=H, A=A, W=W,
                off_w1=off_w1, off_b1=off_b1, off_w2=off_w2, off_b2=off_b2)
    return P, meta


def make_opnet_forward(meta, batch, out_dtype=jnp.float32):
    """Build the Pallas forward: (x, packed_params) -> (batch, N_ACTIONS)."""
    S, H, A = meta["S"], meta["H"], meta["A"]
    ow1, ob1 = meta["off_w1"], meta["off_b1"]
    ow2, ob2 = meta["off_w2"], meta["off_b2"]

    def kernel(x_ref, p_ref, o_ref):
        x = x_ref[...]                              # (B, S) f32
        # Static, sublane-aligned slices of the single packed parameter buffer.
        w1t = p_ref[ow1:ow1 + S, :]                 # (S, W); cols >= H are zero
        b1 = p_ref[ob1:ob1 + 1, :]                  # (1, W)
        w2t = p_ref[ow2:ow2 + H, :]                 # (H, W); cols >= A are zero
        b2 = p_ref[ob2:ob2 + 1, :]                  # (1, W)

        # fc1 + ReLU: f32 MXU matmul, explicit f32 epilogue.
        h = jnp.dot(x, w1t, preferred_element_type=jnp.float32) + b1
        h = jnp.maximum(h, 0.0)                     # (B, W)

        # out layer; zero-padded columns of w2t/b2 keep the extra lanes at 0.
        y = jnp.dot(h[:, :H], w2t, preferred_element_type=jnp.float32) + b2
        o_ref[...] = y[:, :A].astype(o_ref.dtype)   # (B, A)

    return pl.pallas_call(
        kernel,
        out_shape=jax.ShapeDtypeStruct((batch, A), out_dtype),
        # No grid: one invocation, whole (tiny) operands resident in VMEM.
        in_specs=[
            pl.BlockSpec(memory_space=pltpu.MemorySpace.VMEM),   # x
            pl.BlockSpec(memory_space=pltpu.MemorySpace.VMEM),   # packed params
        ],
        out_specs=pl.BlockSpec(memory_space=pltpu.MemorySpace.VMEM),
    )


if __name__ == "__main__":
    # Small shapes implied by the module: N_STATES=16, N_HIDDEN=32, N_ACTIONS=4, batch=8
    B, N_STATES, N_HIDDEN, N_ACTIONS = 8, 16, 32, 4
    init_w = 0.1

    key = jax.random.PRNGKey(0)
    kx, kw1, kb1, kw2, kb2 = jax.random.split(key, 5)

    x = jax.random.normal(kx, (B, N_STATES), dtype=jnp.float32)

    # Deterministic parameter init mirroring OpNet.__init__:
    #   weights ~ Normal(0, init_w); biases use PyTorch's default uniform init.
    w1 = init_w * jax.random.normal(kw1, (N_HIDDEN, N_STATES), dtype=jnp.float32)
    bound1 = 1.0 / jnp.sqrt(N_STATES)
    b1 = jax.random.uniform(kb1, (N_HIDDEN,), minval=-bound1, maxval=bound1,
                            dtype=jnp.float32)
    w2 = init_w * jax.random.normal(kw2, (N_ACTIONS, N_HIDDEN), dtype=jnp.float32)
    bound2 = 1.0 / jnp.sqrt(N_HIDDEN)
    b2 = jax.random.uniform(kb2, (N_ACTIONS,), minval=-bound2, maxval=bound2,
                            dtype=jnp.float32)

    # Pack + pre-transpose parameters ONCE (amortized across all forward calls).
    packed, meta = pack_opnet_params(w1, b1, w2, b2)
    packed = jax.block_until_ready(packed)

    opnet_forward = jax.jit(make_opnet_forward(meta, B))
    out = opnet_forward(x, packed)
    jax.block_until_ready(out)

    # Pure-JAX reference (same semantics as the PyTorch forward).
    ref = jnp.maximum(x @ w1.T + b1, 0.0) @ w2.T + b2
    assert out.shape == (B, N_ACTIONS)
    assert jnp.allclose(out, ref, atol=1e-5, rtol=1e-5)

    print("KERNEL_OK")
</pallas_src>

<mosaic_0001>
module attributes {stable_mosaic.version = 11 : i64} {
  func.func @kernel(%arg0: memref<8x16xf32, #tpu.memory_space<vmem>>, %arg1: memref<64x32xf32, #tpu.memory_space<vmem>>, %arg2: memref<8x4xf32, #tpu.memory_space<vmem>>) attributes {dimension_semantics = [], scalar_prefetch = 0 : i64, scratch_operands = 0 : i64, tpu.core_type = #tpu.core_type<tc>} {
    %c0 = arith.constant 0 : index
    %c0_0 = arith.constant 0 : index
    %0 = vector.load %arg0[%c0, %c0_0] : memref<8x16xf32, #tpu.memory_space<vmem>>, vector<8x16xf32>
    %c0_1 = arith.constant 0 : index
    %c0_2 = arith.constant 0 : index
    %1 = vector.load %arg1[%c0_1, %c0_2] : memref<64x32xf32, #tpu.memory_space<vmem>>, vector<16x32xf32>
    %c16 = arith.constant 16 : index
    %c0_3 = arith.constant 0 : index
    %2 = vector.load %arg1[%c16, %c0_3] : memref<64x32xf32, #tpu.memory_space<vmem>>, vector<1x32xf32>
    %c24 = arith.constant 24 : index
    %c0_4 = arith.constant 0 : index
    %3 = vector.load %arg1[%c24, %c0_4] : memref<64x32xf32, #tpu.memory_space<vmem>>, vector<32x32xf32>
    %c56 = arith.constant 56 : index
    %c0_5 = arith.constant 0 : index
    %4 = vector.load %arg1[%c56, %c0_5] : memref<64x32xf32, #tpu.memory_space<vmem>>, vector<1x32xf32>
    %cst = arith.constant dense<0.000000e+00> : vector<8x32xf32>
    %5 = tpu.matmul %0, %1, %cst {dimension_numbers = #tpu.dot_dimension_numbers<[1], [0], [0], [1], [0, 0, 1, 1], [], []>} : vector<8x16xf32>, vector<16x32xf32>, vector<8x32xf32> -> vector<8x32xf32>
    %6 = vector.broadcast %2 : vector<1x32xf32> to vector<8x32xf32>
    %7 = arith.addf %5, %6 : vector<8x32xf32>
    %cst_6 = arith.constant 0.000000e+00 : f32
    %8 = vector.broadcast %cst_6 : f32 to vector<8x32xf32>
    %9 = arith.maximumf %7, %8 : vector<8x32xf32>
    %cst_7 = arith.constant dense<0.000000e+00> : vector<8x32xf32>
    %10 = tpu.matmul %9, %3, %cst_7 {dimension_numbers = #tpu.dot_dimension_numbers<[1], [0], [0], [1], [0, 0, 1, 1], [], []>} : vector<8x32xf32>, vector<32x32xf32>, vector<8x32xf32> -> vector<8x32xf32>
    %11 = vector.broadcast %4 : vector<1x32xf32> to vector<8x32xf32>
    %12 = arith.addf %10, %11 : vector<8x32xf32>
    %13 = vector.extract_strided_slice %12 {offsets = [0, 0], sizes = [8, 4], strides = [1, 1]} : vector<8x32xf32> to vector<8x4xf32>
    %c0_8 = arith.constant 0 : index
    %c0_9 = arith.constant 0 : index
    %14 = vector.load %arg2[%c0_8, %c0_9] : memref<8x4xf32, #tpu.memory_space<vmem>>, vector<8x4xf32>
    tpu.vector_store %arg2[%c0_8, %c0_9], %13 {strides = array<i32>} : memref<8x4xf32, #tpu.memory_space<vmem>>, vector<8x4xf32>,
    return
  }
}

</mosaic_0001>

<bundles_post_ra>
// kernel: tpu_custom_call.1
= control target key start
LH: loop header
LB: loop body
LE: loop exit
PB: predicated region body
PF: predicated region fallthrough
CT: control target
= control target key end

     0   :  { %v215_v0 = vmov 0.0   ;;  %vm216_vm0 = vmmov 0   ;;  %vm24_vm1 = vcmask 130048   ;;  %vm103_vm2 = vcmask 261120   ;;  %s262_s1 = inlined_call_operand.vmem [shape: f32[64,32], index: 1, kind: input, shape index: {}]   ;;  %s263_s0 = inlined_call_operand.vmem [shape: f32[8,16], index: 0, kind: input, shape index: {}]   ;;  %s264_s2 = inlined_call_operand.vmem [shape: f32[8,4], index: 2, kind: output, shape index: {}]  }
   0x1   :  { %195 = vmatprep.subr.mxu0 %v215_v0  ;;  %v13_v1 = vld [vmem:[%s262_s1 + $0x8] sm:$0xff]  ;;  %v12_v2 = vld [vmem:[%s262_s1] sm:$0xff]  ;;  %199 = vmatprep.mubr.msk.f32.mxu0 %vm216_vm0, %v215_v0  ;;  %v18_v4 = vld [vmem:[%s262_s1 + $0x30] sm:$0xff]  ;;  %vm177_vm3 = vcmask 31744  }
   0x2   :  { %196 = vmatpush3.msra.mxu0 %v13_v1  ;;  %v11_v3 = vld [vmem:[%s263_s0] sm:$0xff]  ;;  %202 = vmatprep.subr.mxu1 %v215_v0  ;;  %v17_v5 = vld [vmem:[%s262_s1 + $0x28] sm:$0xff]  ;;  %v15_v7 = vld [vmem:[%s262_s1 + $0x18] sm:$0xff] }
   0x3   :  { %197 = vmatprep.subr.mxu0 %v215_v0  ;;  %203 = vmatpush3.msra.mxu1 %v18_v4  ;;  %v16_v6 = vld [vmem:[%s262_s1 + $0x20] sm:$0xff]  ;;  %v183_v8 = vld [vmem:[%s262_s1 + $0x10] ss:$0 sm:$0xff]  ;;  %v185_v13 = vld [vmem:[%s262_s1 + $0x38] ss:$0 sm:$0xff] }
   0x4   :  { %198 = vmatpush3.msra.mxu0 %v12_v2  ;;  %204 = vmatprep.subr.mxu1 %v215_v0 }
   0x5   :  { %200 = vmatmul.mubr.msk.f32.vlgmr.msra.gmra.mxu0 %vm24_vm1, %v11_v3  ;;  %210 = vmatprep.mubr.msk.f32.mxu1 %vm216_vm0, %v215_v0 }
   0x6   :  { %205 = vmatpush3.msra.mxu1 %v17_v5 }
   0x7   :  { %206 = vmatprep.subr.mxu1 %v215_v0 }
   0x8   :  { %207 = vmatpush3.msra.mxu1 %v16_v6 }
   0x9   :  { %208 = vmatprep.subr.mxu1 %v215_v0 }
   0xa   :  { %209 = vmatpush3.msra.mxu1 %v15_v7 }
  0xc5   :  { %v94_v9 = vpop.f32.mrf.mxu0 }
  0xc6   :  { %v95_v10 = vadd.f32 %v183_v8, %v94_v9 }
  0xc7   :  { %v201_v11 = vpop.f32.mrf.mxu0 }
  0xc8   :  { %v98_v12 = vmax.f32 %v95_v10, 0.0 }
  0xca   :  { %211 = vmatmul.mubr.msk.f32.vlgmr.msra.gmra.mxu1 %vm103_vm2, %v98_v12 }
 0x18a   :  { %v173_v14 = vpop.f32.mrf.mxu1 }
 0x18b   :  { %v174_v15 = vadd.f32 %v185_v13, %v173_v14 }
 0x18c   :  { %v212_v16 = vpop.f32.mrf.mxu1 }
 0x18d   :  { %178 = vst.msk [vmem:[%s264_s2] sm:$0xff] %vm177_vm3, %v174_v15 }

</bundles_post_ra>
